<compile_context>
chip_gen: v7x
topology: tpu7x:2x2x1
jax: 0.10.0
libtpu: 0.0.40
codegen_flags: <defaults>
</compile_context>

<pallas_src>
import jax
import jax.numpy as jnp
from jax.experimental import pallas as pl
from jax.experimental.pallas import tpu as pltpu

KERNEL_SIZE = 4  # HEALPix unpool factor (fixed in the PyTorch module)

# Double-buffered (input + 4x output) tile footprint budget; conservative
# across v5e / v6e / v7x scoped-VMEM limits. Re-sweep per generation if needed.
_VMEM_TILE_BUDGET_BYTES = 16 * 1024 * 1024
_VMEM_LIMIT_BYTES = 32 * 1024 * 1024
_MAX_PIXEL_TILE = 2048  # 512-2048 row tiles already reach ~85%+ of HBM roofline


def _unpool_kernel(x_ref, o_ref):
    """x_ref: (1, TP, F) -> o_ref: (1, KERNEL_SIZE*TP, F), out[4*p + r] = x[p]."""
    x = x_ref[...]
    tp = x.shape[1]
    # One sublane-strided store per copy keeps the output block dense
    # (unmasked writes + contiguous writeback DMA), instead of a padded
    # (..., 4, F) layout.
    for r in range(KERNEL_SIZE):
        o_ref[:, pl.ds(r, tp, stride=KERNEL_SIZE), :] = x


def _pick_pixel_tile(p, f, itemsize):
    """Largest sublane-aligned pixel tile whose pipelined footprint fits VMEM."""
    # Sublane alignment per packed dtype: f32 -> 8, bf16 -> 16, int8/fp8 -> 32.
    align = 8 * max(1, 4 // itemsize)
    per_row = 2 * (1 + KERNEL_SIZE) * f * itemsize  # double-buffered in + out
    tp = _VMEM_TILE_BUDGET_BYTES // max(per_row, 1)
    tp = min(tp, _MAX_PIXEL_TILE, p)
    if tp >= p:
        return p  # full pixel extent: always a legal block shape
    return max((tp // align) * align, align)


def healpix_avg_unpool(x, *, pixel_tile=None):
    """x: [B, P, F] -> [B, KERNEL_SIZE*P, F] (nearest 'unpool' along pixels)."""
    b, p, f = x.shape
    itemsize = jnp.dtype(x.dtype).itemsize
    tp = pixel_tile if pixel_tile is not None else _pick_pixel_tile(p, f, itemsize)
    n_ptiles = pl.cdiv(p, tp)

    grid_spec = pl.GridSpec(
        grid=(b, n_ptiles),
        in_specs=[
            pl.BlockSpec((1, tp, f), lambda bi, pi: (bi, pi, 0)),
        ],
        out_specs=pl.BlockSpec(
            (1, KERNEL_SIZE * tp, f), lambda bi, pi: (bi, pi, 0)
        ),
    )

    return pl.pallas_call(
        _unpool_kernel,
        out_shape=jax.ShapeDtypeStruct((b, KERNEL_SIZE * p, f), x.dtype),
        grid_spec=grid_spec,
        compiler_params=pltpu.CompilerParams(
            # Batch and pixel-tile axes are independent -> shard across TCs.
            dimension_semantics=("parallel", "parallel"),
            vmem_limit_bytes=_VMEM_LIMIT_BYTES,
        ),
        # Pure-bandwidth op: read 1x, write KERNEL_SIZE x, zero FLOPs.
        cost_estimate=pl.CostEstimate(
            flops=0,
            transcendentals=0,
            bytes_accessed=(1 + KERNEL_SIZE) * b * p * f * itemsize,
        ),
    )(x)


if __name__ == "__main__":
    key = jax.random.PRNGKey(0)
    # Small but representative: F is a multiple of 128 (lane-dense stores) and
    # pixel_tile=8 forces a multi-tile pixel grid so the tiled path is exercised.
    B, P, F = 2, 32, 128
    x = jax.random.normal(key, (B, P, F), dtype=jnp.float32)

    out = healpix_avg_unpool(x, pixel_tile=8)
    out = jax.block_until_ready(out)

    # reference: nearest upsample by 4 along the pixel axis
    ref = jnp.repeat(x, KERNEL_SIZE, axis=1)

    assert out.shape == (B, KERNEL_SIZE * P, F), out.shape
    assert out.dtype == x.dtype
    assert jnp.array_equal(out, ref), "mismatch vs reference"

    print("KERNEL_OK")
</pallas_src>

<mosaic_0001>
module attributes {stable_mosaic.version = 11 : i64} {
  func.func @_unpool_kernel(%arg0: i32, %arg1: i32, %arg2: memref<1x8x128xf32, #tpu.memory_space<vmem>>, %arg3: memref<1x32x128xf32, #tpu.memory_space<vmem>>) attributes {dimension_semantics = [#tpu.dimension_semantics<parallel>, #tpu.dimension_semantics<parallel>], iteration_bounds = array<i64: 2, 4>, scalar_prefetch = 0 : i64, scratch_operands = 0 : i64, tpu.core_type = #tpu.core_type<tc>, window_params = [{transform_indices = @transform_0, window_bounds = array<i64: 1, 8, 128>}, {transform_indices = @transform_1, window_bounds = array<i64: 1, 32, 128>}]} {
    %c0 = arith.constant 0 : index
    %c0_0 = arith.constant 0 : index
    %c0_1 = arith.constant 0 : index
    %0 = vector.load %arg2[%c0, %c0_0, %c0_1] : memref<1x8x128xf32, #tpu.memory_space<vmem>>, vector<1x8x128xf32>
    %c0_2 = arith.constant 0 : index
    %c0_3 = arith.constant 0 : index
    %c0_4 = arith.constant 0 : index
    %1 = tpu.strided_load %arg3[%c0_2, %c0_3, %c0_4] {strides = array<i32: 1, 4, 1>} : memref<1x32x128xf32, #tpu.memory_space<vmem>>, vector<1x8x128xf32>
    tpu.strided_store %arg3[%c0_2, %c0_3, %c0_4], %0 {strides = array<i32: 1, 4, 1>} : memref<1x32x128xf32, #tpu.memory_space<vmem>>, vector<1x8x128xf32>
    %c0_5 = arith.constant 0 : index
    %c1 = arith.constant 1 : index
    %c0_6 = arith.constant 0 : index
    %2 = tpu.strided_load %arg3[%c0_5, %c1, %c0_6] {strides = array<i32: 1, 4, 1>} : memref<1x32x128xf32, #tpu.memory_space<vmem>>, vector<1x8x128xf32>
    tpu.strided_store %arg3[%c0_5, %c1, %c0_6], %0 {strides = array<i32: 1, 4, 1>} : memref<1x32x128xf32, #tpu.memory_space<vmem>>, vector<1x8x128xf32>
    %c0_7 = arith.constant 0 : index
    %c2 = arith.constant 2 : index
    %c0_8 = arith.constant 0 : index
    %3 = tpu.strided_load %arg3[%c0_7, %c2, %c0_8] {strides = array<i32: 1, 4, 1>} : memref<1x32x128xf32, #tpu.memory_space<vmem>>, vector<1x8x128xf32>
    tpu.strided_store %arg3[%c0_7, %c2, %c0_8], %0 {strides = array<i32: 1, 4, 1>} : memref<1x32x128xf32, #tpu.memory_space<vmem>>, vector<1x8x128xf32>
    %c0_9 = arith.constant 0 : index
    %c3 = arith.constant 3 : index
    %c0_10 = arith.constant 0 : index
    %4 = tpu.strided_load %arg3[%c0_9, %c3, %c0_10] {strides = array<i32: 1, 4, 1>} : memref<1x32x128xf32, #tpu.memory_space<vmem>>, vector<1x8x128xf32>
    tpu.strided_store %arg3[%c0_9, %c3, %c0_10], %0 {strides = array<i32: 1, 4, 1>} : memref<1x32x128xf32, #tpu.memory_space<vmem>>, vector<1x8x128xf32>
    return
  }
  func.func @transform_0(%arg0: i32, %arg1: i32) -> (i32, i32, i32) {
    %c0_i32 = arith.constant 0 : i32
    %c0_i32_0 = arith.constant 0 : i32
    return %arg0, %arg1, %c0_i32 : i32, i32, i32
  }
  func.func @transform_1(%arg0: i32, %arg1: i32) -> (i32, i32, i32) {
    %c0_i32 = arith.constant 0 : i32
    %c0_i32_0 = arith.constant 0 : i32
    return %arg0, %arg1, %c0_i32 : i32, i32, i32
  }
}

</mosaic_0001>

<bundles_post_ra>
// kernel: tpu_custom_call.1
= control target key start
LH: loop header
LB: loop body
LE: loop exit
PB: predicated region body
PF: predicated region fallthrough
CT: control target
= control target key end

     0   :  { %6 = vsyncpa [#allocation3], 0  ;;  %s704_s0 = inlined_call_operand.hbm [shape: f32[2,32,128], index: 0, kind: input, shape index: {}]   ;;  %s705_s1 = inlined_call_operand.hbm [shape: f32[2,128,128], index: 1, kind: output, shape index: {}]  }
   0x1   :  { %8 = vsyncpa [#allocation3 + $0x1], 0 }
   0x2   :  { %9 = vsyncpa [#allocation4], 0 }
   0x3   :  { %11 = vsyncpa [#allocation4 + $0x1], 0  ;;  %s507_s6 = smov 0   ;;  %s509_s7 = smov 0  }
   0x4   :  { %s511_s8 = smov 0   ;;  %s513_s9 = smov 0  }
   0x5   :  { %s515_s10 = smov 0   ;;  %s517_s11 = smov 0  }
   0x6   :  { %s519_s12 = smov 0   ;;  %s521_s13 = smov 0  }
   0x7 LB: > { %s264_s14 = sadd.s32 4294967295, %s491_s13   ;;  %s265_s15 = sadd.s32 4294967294, %s491_s13   ;;  %s491_s13 = sphi %s521_s13, %s17_s13   ;;  %s487_s12 = sphi %s519_s12, %s722_s12   ;;  %s483_s11 = sphi %s517_s11, %s721_s11   ;;  %s479_s10 = sphi %s515_s10, %s720_s10   ;;  %s475_s9 = sphi %s513_s9, %s719_s9   ;;  %s471_s8 = sphi %s511_s8, %s718_s8   ;;  %s467_s7 = sphi %s509_s7, %s717_s7   ;;  %s463_s6 = sphi %s507_s6, %s716_s6  }
   0x8   : > { %s26_s16 = sadd.s32 1, %s483_s11  ;;  %s29_s17 = sadd.s32 1, %s487_s12 }
   0x9   : > { %p27_p0 = scmp.ge.s32.totalorder %s26_s16, 4  ;;  %s38_s18 = sadd.s32 1, %s471_s8 }
   0xa   : > { %p45_p1 = scmp.ne.s32.totalorder %s471_s8, %s467_s7  ;;  %p46_p2 = scmp.eq.s32.totalorder %s491_s13, 0 }
   0xb   : > { %s724_s16 = smov (%p27_p0, %s26_s16), 0  ;;  %s726_s17 = smov (!%p27_p0, %s29_s17), %s487_s12 }
   0xc   : > { %s34_s19 = ssub.s32 %s483_s11, %s724_s16  ;;  %p560_p3 = por %p46_p2, %p45_p1 }
   0xd   : > { %p31_p4 = scmp.ge.s32.totalorder %s726_s17, 2  ;;  %p51_p5 = scmp.ne.s32.totalorder %s467_s7, %s463_s6 }
   0xe   : > { %p52_p6 = scmp.eq.s32.totalorder %s264_s14, 0  ;;  %p77_p7 = scmp.eq.s32.totalorder %s264_s14, 7 }
   0xf   : > { %s728_s17 = smov (%p31_p4, %s726_s17), 0  ;;  %p83_p10 = scmp.eq.s32.totalorder %s265_s15, 7 }
  0x10   : > { %p568_p8 = por %p52_p6, %p51_p5  ;;  %p572_p9 = por %p77_p7, %p45_p1 }
  0x11   : > { %s33_s23 = ssub.s32 %s487_s12, %s728_s17  ;;  %p578_p12 = por %p83_p10, %p51_p5 }
  0x12   : > { %s709_s22 = scalar_select %p572_p9, 1, 0 }
  0x13   : > { %s35_s24 = sor.u32 %s34_s19, %s33_s23  ;;  %p295_p13 = scmp.lt.s32.totalorder %s491_s13, 8 }
  0x14   : > { %p36_p11 = scmp.eq.s32.totalorder %s35_s24, 0  ;;  %s103_s26 = sand.u32 1, %s471_s8  }
  0x15   : > { %s710_s25 = scalar_select %p578_p12, 1, 0 }
  0x16   : > { %s585_s27 = scalar_select %p36_p11, %s471_s8, %s38_s18  }
  0x17   : > { %s268_s28 = sshll.u32 %s103_s26, 3  ;;  %s269_s29 = sshll.u32 %s487_s12, 2 }
  0x18   : > { %s112_s30 = sadd.s32 %s483_s11, %s269_s29  ;;  %s107_s2 = scalar_lea.vmem [#allocation2], %s268_s28 }
  0x19   : > { %s116_s3 = sshll.u32 %s107_s2, 4  ;;  %s270_s4 = sshll.u32 %s112_s30, 7  ;;  %s589_s3 = int_to_ptr.vmem [resolvable:$true] %s116_s3 }
  0x1a   : > { %s594_s15 = scalar_lea.hbm %s704_s0, %s270_s4  ;;  %p598_p0 = pnand %p295_p13, %p560_p3 }
  0x1b   : > { %s104_s19 = scalar_lea.sflag [#allocation3], %s103_s26  ;;  %s363_s23 = scalar_lea.hbm %s594_s15, 128 }
  0x1c   : > { %p364_p4 = scmp.ne.s32.totalorder %s594_s15, %s363_s23  ;;  %p365_p5 = pneg %p598_p0 }
  0x1d   : > { %s368_s28 = scalar_lea.hbm %s704_s0, 1024  ;;  %p369_p3 = scmp.lt.u32.totalorder %s594_s15, %s704_s0 }
  0x1e   : > { %p366_p6 = pnand %p365_p5, %p364_p4  ;;  %p370_p10 = scmp.lt.u32.totalorder %s368_s28, %s363_s23 }
  0x1f   : > { %p372_p13 = scmp.lt.u32.totalorder %s363_s23, %s594_s15 }
  0x20   : > { %p367_p7 = pneg %p366_p6  ;;  %p371_p11 = por %p370_p10, %p369_p3 }
  0x22   : > { %p373_p1 = por %p372_p13, %p371_p11 }
  0x24   : > { %p374_p2 = pnand %p373_p1, %p367_p7 }
  0x26   : > { %377 = shalt.err (!%p374_p2)
}
  0x27   : > { %s378_s26 = scalar_lea.vmem %s589_s3, 128  ;;  %s493_s2 = smov [#allocation2]  }
  0x28   : > { %p379_p4 = scmp.ne.s32.totalorder %s589_s3, %s378_s26  ;;  %s383_s4 = sshll.u32 %s493_s2, 4  ;;  %s384_s4 = int_to_ptr.vmem [resolvable:$false] %s383_s4 }
  0x29   : > { %s385_s5 = scalar_lea.vmem %s384_s4, 256  ;;  %p386_p9 = scmp.lt.s32.totalorder %s589_s3, %s384_s4 }
  0x2a   : > { %p381_p6 = pnand %p379_p4, %p365_p5  ;;  %p387_p3 = scmp.lt.s32.totalorder %s385_s5, %s378_s26 }
  0x2c   : > { %p382_p12 = pneg %p381_p6  ;;  %p388_p10 = por %p387_p3, %p386_p9 }
  0x2e   : > { %p389_p11 = pnand %p388_p10, %p382_p12 }
  0x30   : > { %392 = shalt.err (!%p389_p11)
}
  0x31   : > { %290 = dma.hbm_to_vmem [thread:$0]  (!%p598_p0), %s594_s15, 128, %s589_s3, %s104_s19  }
  0x32   : > { %p712_p1 = scmp.lt.s32.totalorder %s491_s13, 9  ;;  %p713_p2 = scmp.ge.s32.totalorder %s491_s13, 1 }
  0x34   : > { %p122_p5 = pnand %p713_p2, %p712_p1 }
  0x35   : > { %s634_s14 = sand.u32 (!%p122_p5), 1, %s467_s7  }
  0x36   : > { %125 = sbr.rel (%p122_p5) target bundleno = 91 (0x5b), region = 24  ;;  %s272_s23 = sshll.u32 (!%p122_p5), %s634_s14, 3 }
  0x37   : > { %s128_s20 = scalar_lea.sflag (!%p122_p5), [#allocation3], %s634_s14  ;;  %s131_s24 = scalar_lea.vmem (!%p122_p5), [#allocation2], %s272_s23 }
  0x3d   : > { %454 = dma.done.wait (%p568_p8), %s128_s20, 128  }
  0x3e   : > { %456 = vsyncadd (%p568_p8), %s128_s20, 4294967168  ;;  %s273_s3 = sshll.u32 %s634_s14, 5  ;;  %s278_s15 = sshll.u32 %s475_s9, 2  ;;  %v151_v0 = vld [vmem:[%s131_s24] sm:$0xff] }
  0x3f   : > { %s149_s18 = scalar_lea.vmem [#allocation5], %s273_s3  ;;  %s279_s28 = sshll.u32 %s479_s10, 4 }
  0x40   : > { %s175_s19 = sshll.u32 %s149_s18, 4  ;;  %s172_s29 = sadd.s32 %s279_s28, %s278_s15  ;;  %152 = vst [vmem:[%s149_s18] ss:$4 sm:$0xff] %v151_v0  ;;  %274 = vst [vmem:[%s149_s18 + $0x1] ss:$4 sm:$0xff] %v151_v0  ;;  %s645_s19 = int_to_ptr.vmem [resolvable:$true] %s175_s19 }
  0x41   : > { %s280_s30 = sshll.u32 %s172_s29, 7  ;;  %275 = vst [vmem:[%s149_s18 + $0x2] ss:$4 sm:$0xff] %v151_v0  ;;  %276 = vst [vmem:[%s149_s18 + $0x3] ss:$4 sm:$0xff] %v151_v0  ;;  %s160_s9 = scalar_lea.sflag [#allocation4], %s634_s14 }
  0x42   : > { %s650_s21 = scalar_lea.hbm %s705_s1, %s280_s30  ;;  %s393_s4 = scalar_lea.vmem %s645_s19, 512 }
  0x43   : > { %p394_p8 = scmp.ne.s32.totalorder %s645_s19, %s393_s4  ;;  %p714_p9 = scmp.ne.s32.totalorder %s709_s22, 0 }
  0x44   : > { %s494_s10 = smov [#allocation5]  }
  0x45   : > { %p395_p12 = pnand %p394_p8, %p714_p9  ;;  %s397_s5 = sshll.u32 %s494_s10, 4  ;;  %s398_s5 = int_to_ptr.vmem [resolvable:$false] %s397_s5 }
  0x46   : > { %s399_s23 = scalar_lea.vmem %s398_s5, 1024  ;;  %p400_p7 = scmp.lt.s32.totalorder %s645_s19, %s398_s5 }
  0x47   : > { %p396_p0 = pneg %p395_p12  ;;  %p401_p13 = scmp.lt.s32.totalorder %s399_s23, %s393_s4 }
  0x49   : > { %p402_p4 = por %p401_p13, %p400_p7 }
  0x4b   : > { %p403_p6 = pnand %p402_p4, %p396_p0 }
  0x4d   : > { %406 = shalt.err (!%p403_p6)
}
  0x4e   : > { %s407_s20 = scalar_lea.hbm %s650_s21, 512  ;;  %s411_s15 = scalar_lea.hbm %s705_s1, 4096 }
  0x4f   : > { %p408_p3 = scmp.ne.s32.totalorder %s650_s21, %s407_s20  ;;  %p412_p1 = scmp.lt.u32.totalorder %s650_s21, %s705_s1 }
  0x50   : > { %p413_p2 = scmp.lt.u32.totalorder %s411_s15, %s407_s20  ;;  %p415_p8 = scmp.lt.u32.totalorder %s407_s20, %s650_s21 }
  0x51   : > { %p409_p10 = pnand %p408_p3, %p714_p9 }
  0x52   : > { %p414_p5 = por %p413_p2, %p412_p1 }
  0x53   : > { %p410_p11 = pneg %p409_p10 }
  0x54   : > { %p416_p12 = por %p415_p8, %p414_p5 }
  0x56   : > { %p417_p0 = pnand %p416_p12, %p410_p11 }
  0x58   : > { %420 = shalt.err (!%p417_p0)
}
  0x59   : > { %s495_s29 = smov 128   ;;  %s496_s30 = smov 8  }
  0x5a   : > { %285 = dma.vmem_to_hbm [thread:$0]  (%p714_p9), %s645_s19, 512, %s650_s21, %s160_s9, %s495_s29, %s495_s29, %s496_s30  }
  0x5b PF: > { %p296_p7 = scmp.ge.s32.totalorder %s491_s13, 2  ;;  %s190_s26 = sand.u32 1, %s463_s6  }
  0x5c   : > { %p715_p13 = scmp.ne.s32.totalorder %s710_s25, 0  ;;  %s191_s2 = scalar_lea.sflag [#allocation4], %s190_s26 }
  0x5e   : > { %p292_p4 = pnand %p296_p7, %p715_p13 }
  0x60   : > { %458 = dma.done.wait (!%p292_p4), %s191_s2, 512  }
  0x61   : > { %460 = vsyncadd (!%p292_p4), %s191_s2, 4294966784  ;;  %s17_s13 = sadd.s32 1, %s491_s13   ;;  %s716_s6 = smov %s467_s7 }
  0x62   : > { %p14_p6 = scmp.ge.s32.totalorder %s17_s13, 10   ;;  %s717_s7 = smov %s471_s8 }
  0x63   : > { %s718_s8 = smov %s585_s27  ;;  %s719_s9 = smov %s483_s11 }
  0x64   : > { %s720_s10 = smov %s487_s12  ;;  %s721_s11 = smov %s724_s16 }
  0x65   : > { %s722_s12 = smov %s728_s17  ;;  %16 = sbr.rel (!%p14_p6) target bundleno = 7 (0x7), region = 72 }
  0x6c   :  { %196 = vsyncpa [#allocation3], 1 }
  0x6d   :  { %198 = vsyncpa [#allocation3 + $0x1], 1 }
  0x6e   :  { %199 = vsyncpa [#allocation4], 1 }
  0x6f   :  { %201 = vsyncpa [#allocation4 + $0x1], 1 }

</bundles_post_ra>
